<compile_context>
chip_gen: v7x
topology: tpu7x:2x2x1
jax: 0.10.0
libtpu: 0.0.40
codegen_flags: <defaults>
</compile_context>

<pallas_src>
import jax
import jax.numpy as jnp
from jax.experimental import pallas as pl
from jax.experimental.pallas import tpu as pltpu

LANES = 128
SINGLE_BLOCK_MAX_ROWS = 64   # <= ~32 KiB f32: one block, launch-overhead dominated anyway
MIN_GRID_STEPS = 4           # keep >=4 steps for pipelining / megacore on mid-size inputs


def _max_tile_rows() -> int:
    """Per-generation max tile rows (block = rows x 128 f32)."""
    try:
        kind = jax.devices()[0].device_kind.lower()
    except Exception:
        kind = ""
    # v6e / v7x: 4 MiB blocks (16 MiB double-buffered, under 32 MiB scoped default).
    if "v6" in kind or "v7" in kind:
        return 8192
    # v5e and older / unknown: 2 MiB blocks (8 MiB double-buffered, under 16 MiB).
    return 4096


def _square_add_kernel(offset_ref, x_ref, o_ref):
    # offset_ref: (1,) f32 scalar in SMEM; x_ref / o_ref: (tile_rows, 128) VMEM tiles.
    x = x_ref[...].astype(jnp.float32)           # no-op for f32 inputs
    y = x * x + offset_ref[0]
    o_ref[...] = y.astype(o_ref.dtype)


def square_then_add(x: jax.Array, offset: jax.Array) -> jax.Array:
    """y = offset + x*x, elementwise, computed in a Pallas TPU kernel."""
    orig_shape = x.shape
    orig_dtype = x.dtype

    n = x.size
    x_flat = jnp.ravel(x)

    # Lane-dense (rows, 128) slab. Padding only happens when the flat length is
    # not lane-divisible (never for the 2x4x16x16 target, so no extra HBM pass
    # on the hot path).
    # TODO(synk): for non-128-divisible sizes, replace this pad/slice pair with
    # in-kernel tail masking keyed off an SMEM length scalar.
    rem = n % LANES
    padded_n = n if rem == 0 else n + (LANES - rem)
    if padded_n != n:
        x_flat = jnp.concatenate(
            [x_flat, jnp.zeros((padded_n - n,), dtype=orig_dtype)]
        )
    rows = padded_n // LANES
    x2d = x_flat.reshape(rows, LANES)

    # Tile choice.
    max_tile_rows = _max_tile_rows()
    if rows <= SINGLE_BLOCK_MAX_ROWS:
        # Tiny input: one block (full-extent block shape, so no (8,128) issue).
        tile_rows = rows
    else:
        # Aim for >= MIN_GRID_STEPS grid steps so DMA-in / compute / DMA-out
        # overlap (and v7x can shard steps across both TensorCores), capped at
        # the per-generation max block size. Tile rows kept a multiple of 8;
        # a ragged last block is masked by the cdiv grid.
        target = pl.cdiv(rows, MIN_GRID_STEPS)
        target = ((target + 7) // 8) * 8
        tile_rows = max(8, min(max_tile_rows, target))
    grid = (pl.cdiv(rows, tile_rows),)

    offset_smem = jnp.reshape(offset.astype(jnp.float32), (1,))

    out2d = pl.pallas_call(
        _square_add_kernel,
        out_shape=jax.ShapeDtypeStruct((rows, LANES), orig_dtype),
        grid_spec=pltpu.PrefetchScalarGridSpec(
            num_scalar_prefetch=0,
            grid=grid,
            in_specs=[
                pl.BlockSpec(memory_space=pltpu.SMEM),               # scalar offset
                pl.BlockSpec((tile_rows, LANES), lambda i: (i, 0)),  # x tile
            ],
            out_specs=pl.BlockSpec((tile_rows, LANES), lambda i: (i, 0)),
        ),
        compiler_params=pltpu.CompilerParams(
            dimension_semantics=("parallel",),
        ),
    )(offset_smem, x2d)

    if padded_n != n:
        out = out2d.reshape(-1)[:n].reshape(orig_shape)
    else:
        out = out2d.reshape(orig_shape)
    return out


if __name__ == "__main__":
    key = jax.random.PRNGKey(0)
    # Small NCHW-like input consistent with a generic elementwise module.
    x = jax.random.normal(key, (2, 4, 16, 16), dtype=jnp.float32)

    # Deterministic parameter init (matches nn.Parameter(t.tensor(offset))).
    offset = jnp.float32(3.0)

    y = square_then_add(x, offset)
    y = jax.block_until_ready(y)

    # Correctness check against the reference semantics.
    ref = offset + x * x
    assert y.shape == x.shape and y.dtype == x.dtype
    assert jnp.allclose(y, ref, atol=1e-6, rtol=1e-6)

    print("KERNEL_OK")
</pallas_src>

<mosaic_0001>
module attributes {stable_mosaic.version = 11 : i64} {
  func.func @_square_add_kernel(%arg0: i32, %arg1: memref<1xf32, #tpu.memory_space<smem>>, %arg2: memref<16x128xf32, #tpu.memory_space<vmem>>, %arg3: memref<16x128xf32, #tpu.memory_space<vmem>>) attributes {dimension_semantics = [#tpu.dimension_semantics<parallel>], iteration_bounds = array<i64: 1>, scalar_prefetch = 0 : i64, scratch_operands = 0 : i64, tpu.core_type = #tpu.core_type<tc>, window_params = [{transform_indices = @transform_0, window_bounds = array<i64: 1>}, {transform_indices = @transform_1, window_bounds = array<i64: 16, 128>}, {transform_indices = @transform_2, window_bounds = array<i64: 16, 128>}]} {
    %c0 = arith.constant 0 : index
    %c0_0 = arith.constant 0 : index
    %0 = vector.load %arg2[%c0, %c0_0] : memref<16x128xf32, #tpu.memory_space<vmem>>, vector<16x128xf32>
    %1 = arith.mulf %0, %0 : vector<16x128xf32>
    %c0_1 = arith.constant 0 : index
    %2 = memref.load %arg1[%c0_1] : memref<1xf32, #tpu.memory_space<smem>>
    %3 = vector.broadcast %2 : f32 to vector<16x128xf32>
    %4 = arith.addf %1, %3 : vector<16x128xf32>
    %c0_2 = arith.constant 0 : index
    %c0_3 = arith.constant 0 : index
    %5 = vector.load %arg3[%c0_2, %c0_3] : memref<16x128xf32, #tpu.memory_space<vmem>>, vector<16x128xf32>
    tpu.vector_store %arg3[%c0_2, %c0_3], %4 {strides = array<i32>} : memref<16x128xf32, #tpu.memory_space<vmem>>, vector<16x128xf32>,
    return
  }
  func.func @transform_0(%arg0: i32) -> i32 {
    %c0_i32 = arith.constant 0 : i32
    %c0_i32_0 = arith.constant 0 : i32
    return %c0_i32 : i32
  }
  func.func @transform_1(%arg0: i32) -> (i32, i32) {
    %c0_i32 = arith.constant 0 : i32
    %c0_i32_0 = arith.constant 0 : i32
    return %arg0, %c0_i32 : i32, i32
  }
  func.func @transform_2(%arg0: i32) -> (i32, i32) {
    %c0_i32 = arith.constant 0 : i32
    %c0_i32_0 = arith.constant 0 : i32
    return %arg0, %c0_i32 : i32, i32
  }
}

</mosaic_0001>

<bundles_post_ra>
// kernel: tpu_custom_call.1
= control target key start
LH: loop header
LB: loop body
LE: loop exit
PB: predicated region body
PF: predicated region fallthrough
CT: control target
= control target key end

     0   :  { %8 = vsyncpa [#allocation4], 0  ;;  %s158_s0 = inlined_call_operand.<no memory space> [shape: f32[1], index: 0, kind: input, shape index: {}]   ;;  %s159_s1 = inlined_call_operand.hbm [shape: f32[16,128], index: 1, kind: input, shape index: {}]   ;;  %s160_s2 = inlined_call_operand.hbm [shape: f32[16,128], index: 2, kind: output, shape index: {}]  }
   0x1   :  { %9 = vsyncpa [#allocation5], 0  ;;  %s106_s9 = smov [#allocation3]   ;;  %s58_s13 = scalar_lea.hbm %s159_s1, 256 }
   0x2   :  { %s17_s10 = sshll.u32 %s106_s9, 4  ;;  %p59_p0 = scmp.ne.s32.totalorder %s159_s1, %s58_s13  ;;  %s18_s10 = int_to_ptr.vmem [resolvable:$true] %s17_s10 }
   0x3   :  { %p62_p1 = scmp.lt.u32.totalorder %s58_s13, %s159_s1 }
   0x5   :  { %p64_p2 = pnand %p62_p1, %p59_p0 }
   0x7   :  { %67 = shalt.err (!%p64_p2)
}
   0x8   :  { %s68_s18 = scalar_lea.vmem %s18_s10, 256  ;;  %p73_p4 = scmp.lt.s32.totalorder %s18_s10, %s18_s10 }
   0x9   :  { %p69_p3 = scmp.ne.s32.totalorder %s18_s10, %s68_s18  ;;  %p74_p5 = scmp.lt.s32.totalorder %s68_s18, %s68_s18 }
   0xb   :  { %p75_p6 = por %p74_p5, %p73_p4 }
   0xd   :  { %p76_p7 = pnand %p75_p6, %p69_p3 }
   0xf   :  { %79 = shalt.err (!%p76_p7)
}
  0x10   :  { %s107_s19 = smov 128   ;;  %s108_s20 = smov 8  }
  0x11   :  { %23 = dma.hbm_to_vmem [thread:$0]  %s159_s1, 256, %s18_s10, [#allocation4], %s107_s19, %s107_s19, %s108_s20  }
  0x12   :  { %102 = dma.done.wait [#allocation4], 256  }
  0x13   :  { %103 = vsyncadd [#allocation4], 4294967040  ;;  %v27_v0 = vld [vmem:[#allocation3] sm:$0xff]  ;;  %v32_v1 = vstv %s158_s0  ;;  %v28_v2 = vld [vmem:[#allocation3 + $0x8] sm:$0xff]  ;;  %s109_s25 = smov [#allocation6]  }
  0x14   :  { %s42_s26 = sshll.u32 %s109_s25, 4  ;;  %v29_v3 = vmul.f32 %v27_v0, %v27_v0  ;;  %v30_v4 = vmul.f32 %v28_v2, %v28_v2  ;;  %s43_s26 = int_to_ptr.vmem [resolvable:$true] %s42_s26 }
  0x15   :  { %s80_s27 = scalar_lea.vmem %s43_s26, 256  ;;  %p85_p9 = scmp.lt.s32.totalorder %s43_s26, %s43_s26 }
  0x16   :  { %v33_v5 = vadd.f32 %v32_v1, %v29_v3  ;;  %v34_v6 = vadd.f32 %v32_v1, %v30_v4  ;;  %p81_p8 = scmp.ne.s32.totalorder %s43_s26, %s80_s27  ;;  %p86_p10 = scmp.lt.s32.totalorder %s80_s27, %s80_s27 }
  0x18   :  { %35 = vst [vmem:[#allocation6] sm:$0xff] %v33_v5  ;;  %36 = vst [vmem:[#allocation6 + $0x8] sm:$0xff] %v34_v6  ;;  %p87_p11 = por %p86_p10, %p85_p9 }
  0x1a   :  { %p88_p12 = pnand %p87_p11, %p81_p8 }
  0x1c   :  { %91 = shalt.err (!%p88_p12)
}
  0x1d   :  { %s92_s0 = scalar_lea.hbm %s160_s2, 256 }
  0x1e   :  { %p93_p13 = scmp.ne.s32.totalorder %s160_s2, %s92_s0  ;;  %p96_p0 = scmp.lt.u32.totalorder %s92_s0, %s160_s2 }
  0x20   :  { %p98_p1 = pnand %p96_p0, %p93_p13 }
  0x22   :  { %101 = shalt.err (!%p98_p1)
}
  0x23   :  { %48 = dma.vmem_to_hbm [thread:$0]  %s43_s26, 256, %s160_s2, [#allocation5], %s107_s19, %s107_s19, %s108_s20  }
  0x24   :  { %104 = dma.done.wait [#allocation5], 256  }
  0x25   :  { %105 = vsyncadd [#allocation5], 4294967040 }
  0x26   :  { %52 = vsyncpa [#allocation4], 1 }
  0x27   :  { %53 = vsyncpa [#allocation5], 1 }

</bundles_post_ra>
